<compile_context>
chip_gen: v7x
topology: tpu7x:2x2x1
jax: 0.10.0
libtpu: 0.0.40
codegen_flags: <defaults>
</compile_context>

<pallas_src>
import functools

import jax
import jax.numpy as jnp
from jax.experimental import pallas as pl
from jax.experimental.pallas import tpu as pltpu

LN_EPS = 1e-5  # torch.nn.LayerNorm default


def _round_up(n, m):
    return ((n + m - 1) // m) * m


def _vmem_budgets():
    """Returns (tiling budget bytes, scoped vmem_limit cap bytes), gen-aware."""
    try:
        cap = int(pltpu.get_tpu_info().vmem_capacity_bytes)
    except Exception:
        cap = 0
    if cap >= (100 << 20):            # v5e / v6e: 128 MiB physical VMEM
        return 96 << 20, 110 << 20
    # v7x (64 MiB physical) or unknown generation: stay conservative.
    return 48 << 20, 56 << 20


def _prenorm_kernel(x_ref, w_ref, cs_ref, b_ref, o_ref, *, d_true):
    """One (row-tile, dout-tile) block of LayerNorm -> Linear.

    LayerNorm is applied after the matmul:
        out = ((x @ w) - mean * colsum(w)) * rsqrt(var + eps) + b
    mean / var are per-row scalars, so this is algebraically identical to
    normalizing before the matmul (gamma/beta are folded into w/b upstream).
    """
    x = x_ref[...]                                        # (tm, Dp)
    xf = x.astype(jnp.float32)

    # Single-pass LN statistics in f32 (XLU reductions overlap the MXU push).
    # NOTE: E[x^2]-E[x]^2 can lose precision for inputs with a very large mean;
    # the clamp keeps it safe and LN inputs are normally well-centered.
    inv_d = jnp.float32(1.0 / d_true)
    s = jnp.sum(xf, axis=-1, keepdims=True)               # (tm, 1)
    ss = jnp.sum(xf * xf, axis=-1, keepdims=True)         # (tm, 1)
    mean = s * inv_d
    var = jnp.maximum(ss * inv_d - mean * mean, 0.0)
    inv = jax.lax.rsqrt(var + LN_EPS)                     # (tm, 1)

    # fn(normed): Linear on the MXU in the stored weight dtype, f32 accumulate.
    acc = jnp.dot(x.astype(w_ref.dtype), w_ref[...],
                  preferred_element_type=jnp.float32)     # (tm, tn)

    out = (acc - mean * cs_ref[...]) * inv + b_ref[...]
    o_ref[...] = out.astype(o_ref.dtype)


def prenorm_fold_params(gamma, beta, w, b, *, matmul_dtype=None):
    """Fold the LayerNorm affine into the linear layer and pad feature dims.

    Run this ONCE at parameter-load time (outside the per-step jit): it makes
    a full pass over the weight.

      (z*gamma + beta) @ w + b == z @ (gamma[:,None]*w) + (beta @ w + b)

    Returns a dict of arrays / sizes consumed by `prenorm_apply`.
    """
    D, D_out = w.shape
    store_dtype = matmul_dtype if matmul_dtype is not None else w.dtype

    gamma_v = gamma.reshape(D).astype(jnp.float32)
    beta_v = beta.reshape(D).astype(jnp.float32)
    w_f32 = w.astype(jnp.float32)
    w_fold = gamma_v[:, None] * w_f32                                   # (D, D_out)
    b_fold = beta_v @ w_f32 + b.reshape(D_out).astype(jnp.float32)      # (D_out,)

    # Lane-dense padding of the feature dims (multiples of 128); padded
    # weight rows/cols are zero so results are exact.
    Dp = _round_up(D, 128)
    Dop = _round_up(D_out, 128)

    w_store = jnp.pad(w_fold, ((0, Dp - D), (0, Dop - D_out))).astype(store_dtype)
    # Column sums of the weight *as stored* (f32) for the post-matmul mean
    # correction.
    cs = jnp.sum(w_store.astype(jnp.float32), axis=0).reshape(1, Dop)
    b_p = jnp.pad(b_fold, (0, Dop - D_out)).reshape(1, Dop)

    return dict(w=w_store, colsum=cs, bias=b_p,
                d=int(D), d_out=int(D_out), dp=int(Dp), dop=int(Dop))


def prenorm_apply(x, params, *, block_rows=None, block_cols=None):
    """PreNorm forward with pre-folded params: LayerNorm(D), then Linear."""
    B, S, D = x.shape
    assert D == params["d"], (D, params["d"])
    D_out, Dp, Dop = params["d_out"], params["dp"], params["dop"]
    w_p, cs_p, b_p = params["w"], params["colsum"], params["bias"]
    N = B * S

    x_bytes = jnp.dtype(x.dtype).itemsize
    w_bytes = jnp.dtype(w_p.dtype).itemsize
    out_bytes = x_bytes

    budget, limit_cap = _vmem_budgets()
    big_vmem = budget >= (80 << 20)

    # ---- D_out tile: keep the weight fully resident (single-buffered,
    # grid-invariant) when it fits in ~1/3 of the budget; otherwise tile the
    # output columns on a second parallel grid axis.
    if block_cols is not None:
        tn = min(_round_up(block_cols, 128), Dop)
    elif Dp * Dop * w_bytes <= budget // 3:
        tn = Dop
    else:
        tn = 1024
        while tn > 128 and 2 * Dp * tn * w_bytes > budget // 2:
            tn //= 2
        tn = min(tn, Dop)
    weight_invariant = (tn == Dop)
    w_buffers = 1 if weight_invariant else 2

    # ---- Row tile: biggest that fits the budget (amortizes per-step overhead).
    def vmem_estimate(bm):
        return (2 * bm * Dp * x_bytes            # x tile (double-buffered)
                + 2 * bm * tn * out_bytes        # out tile (double-buffered)
                + w_buffers * Dp * tn * w_bytes  # folded weight
                + w_buffers * 2 * tn * 4)        # colsum + bias (f32)

    if block_rows is None:
        bm = 2048 if (big_vmem and Dp <= 256) else 1024
        while bm > 8 and vmem_estimate(bm) > budget:
            bm //= 2
        block_rows = bm
    block_rows = max(8, min(block_rows, _round_up(N, 8)))
    block_rows = _round_up(block_rows, 8)

    grid = (pl.cdiv(N, block_rows), pl.cdiv(Dop, tn))

    # Rows are never padded (ragged last tile: garbage rows stay in their own
    # rows and out-of-bounds writes are dropped).  Features are padded with
    # zeros only when D is not already lane-aligned.
    x2 = x.reshape(N, D)
    if Dp != D:
        x2 = jnp.pad(x2, ((0, 0), (0, Dp - D)))

    vmem_limit = int(min(limit_cap,
                         max(32 << 20, vmem_estimate(block_rows) + (8 << 20))))

    if weight_invariant:
        w_spec = pl.BlockSpec((Dp, tn), lambda i, j: (0, j),
                              pipeline_mode=pl.Buffered(1))
        cs_spec = pl.BlockSpec((1, tn), lambda i, j: (0, j),
                               pipeline_mode=pl.Buffered(1))
        b_spec = pl.BlockSpec((1, tn), lambda i, j: (0, j),
                              pipeline_mode=pl.Buffered(1))
    else:
        w_spec = pl.BlockSpec((Dp, tn), lambda i, j: (0, j))
        cs_spec = pl.BlockSpec((1, tn), lambda i, j: (0, j))
        b_spec = pl.BlockSpec((1, tn), lambda i, j: (0, j))

    cost = pl.CostEstimate(
        flops=int(2 * N * Dp * Dop),
        transcendentals=int(N),  # one rsqrt per row
        bytes_accessed=int(N * Dp * x_bytes + Dp * Dop * w_bytes
                           + N * Dop * out_bytes + 2 * Dop * 4),
    )

    kernel = functools.partial(_prenorm_kernel, d_true=float(D))

    out2 = pl.pallas_call(
        kernel,
        out_shape=jax.ShapeDtypeStruct((N, Dop), x.dtype),
        grid_spec=pltpu.PrefetchScalarGridSpec(
            num_scalar_prefetch=0,
            grid=grid,
            in_specs=[
                pl.BlockSpec((block_rows, Dp), lambda i, j: (i, 0)),  # x rows
                w_spec,                                               # folded W
                cs_spec,                                              # colsum(W)
                b_spec,                                               # folded bias
            ],
            out_specs=pl.BlockSpec((block_rows, tn), lambda i, j: (i, j)),
        ),
        compiler_params=pltpu.CompilerParams(
            dimension_semantics=("parallel", "parallel"),
            vmem_limit_bytes=vmem_limit),
        cost_estimate=cost,
    )(x2, w_p, cs_p, b_p)

    if Dop != D_out:
        out2 = out2[:, :D_out]
    return out2.reshape(B, S, D_out)


def prenorm_forward(x, gamma, beta, w, b, *, matmul_dtype=None,
                    block_rows=None, block_cols=None):
    """Convenience wrapper: fold + apply.

    For repeated use, call prenorm_fold_params once at parameter-load time and
    prenorm_apply per step, so the gamma/beta fold and weight padding are not
    re-done on every call.
    """
    params = prenorm_fold_params(gamma, beta, w, b, matmul_dtype=matmul_dtype)
    return prenorm_apply(x, params, block_rows=block_rows, block_cols=block_cols)


def _reference(x, gamma, beta, w, b):
    xf = x.astype(jnp.float32)
    mean = jnp.mean(xf, axis=-1, keepdims=True)
    var = jnp.mean((xf - mean) ** 2, axis=-1, keepdims=True)
    normed = (xf - mean) / jnp.sqrt(var + LN_EPS) * gamma + beta
    return (normed @ w.astype(jnp.float32) + b).astype(x.dtype)


if __name__ == "__main__":
    key = jax.random.PRNGKey(0)
    B, S, D = 2, 8, 32

    kx, kw, kb, kg, kbe = jax.random.split(key, 5)
    x = jax.random.normal(kx, (B, S, D), dtype=jnp.float32)

    # LayerNorm params (non-trivial so the gamma/beta folding is exercised).
    gamma = 1.0 + 0.1 * jax.random.normal(kg, (D,), dtype=jnp.float32)
    beta = 0.01 * jax.random.normal(kbe, (D,), dtype=jnp.float32)

    # TODO(synk): `fn` in PreNorm is an arbitrary wrapped sub-module
    # (attention / FFN); it is represented here by a Linear(D, D).
    w = jax.random.normal(kw, (D, D), dtype=jnp.float32) * 0.05
    b = jax.random.normal(kb, (D,), dtype=jnp.float32) * 0.01

    # Fold once (parameter-load time), then apply (per-step path).
    params = prenorm_fold_params(gamma, beta, w, b)
    out = prenorm_apply(x, params)
    out = jax.block_until_ready(out)

    ref = _reference(x, gamma, beta, w, b)
    assert out.shape == (B, S, D), out.shape
    assert jnp.allclose(out, ref, atol=1e-4, rtol=1e-4), \
        float(jnp.max(jnp.abs(out - ref)))

    print("KERNEL_OK")
</pallas_src>

<mosaic_0001>
module attributes {stable_mosaic.version = 11 : i64} {
  func.func @_prenorm_kernel(%arg0: i32, %arg1: i32, %arg2: memref<16x128xf32, #tpu.memory_space<vmem>>, %arg3: memref<128x128xf32, #tpu.memory_space<vmem>>, %arg4: memref<1x128xf32, #tpu.memory_space<vmem>>, %arg5: memref<1x128xf32, #tpu.memory_space<vmem>>, %arg6: memref<16x128xf32, #tpu.memory_space<vmem>>) attributes {dimension_semantics = [#tpu.dimension_semantics<parallel>, #tpu.dimension_semantics<parallel>], iteration_bounds = array<i64: 1, 1>, scalar_prefetch = 0 : i64, scratch_operands = 0 : i64, tpu.core_type = #tpu.core_type<tc>, window_params = [{transform_indices = @transform_0, window_bounds = array<i64: 16, 128>}, {pipeline_mode = #tpu.pipeline_mode<synchronous>, transform_indices = @transform_1, window_bounds = array<i64: 128, 128>}, {pipeline_mode = #tpu.pipeline_mode<synchronous>, transform_indices = @transform_2, window_bounds = array<i64: 1, 128>}, {pipeline_mode = #tpu.pipeline_mode<synchronous>, transform_indices = @transform_3, window_bounds = array<i64: 1, 128>}, {transform_indices = @transform_4, window_bounds = array<i64: 16, 128>}]} {
    %c0 = arith.constant 0 : index
    %c0_0 = arith.constant 0 : index
    %0 = vector.load %arg2[%c0, %c0_0] : memref<16x128xf32, #tpu.memory_space<vmem>>, vector<16x128xf32>
    %cst = arith.constant dense<0.000000e+00> : vector<16xf32>
    %1 = vector.multi_reduction <add>, %0, %cst [1] : vector<16x128xf32> to vector<16xf32>
    %2 = vector.shape_cast %1 : vector<16xf32> to vector<16x1xf32>
    %3 = arith.mulf %0, %0 : vector<16x128xf32>
    %cst_1 = arith.constant dense<0.000000e+00> : vector<16xf32>
    %4 = vector.multi_reduction <add>, %3, %cst_1 [1] : vector<16x128xf32> to vector<16xf32>
    %5 = vector.shape_cast %4 : vector<16xf32> to vector<16x1xf32>
    %cst_2 = arith.constant 3.125000e-02 : f32
    %6 = vector.broadcast %cst_2 : f32 to vector<16x1xf32>
    %7 = arith.mulf %2, %6 : vector<16x1xf32>
    %cst_3 = arith.constant 3.125000e-02 : f32
    %8 = vector.broadcast %cst_3 : f32 to vector<16x1xf32>
    %9 = arith.mulf %5, %8 : vector<16x1xf32>
    %10 = arith.mulf %7, %7 : vector<16x1xf32>
    %11 = arith.subf %9, %10 : vector<16x1xf32>
    %cst_4 = arith.constant 0.000000e+00 : f32
    %12 = vector.broadcast %cst_4 : f32 to vector<16x1xf32>
    %13 = arith.maximumf %11, %12 : vector<16x1xf32>
    %cst_5 = arith.constant 9.99999974E-6 : f32
    %14 = vector.broadcast %cst_5 : f32 to vector<16x1xf32>
    %15 = arith.addf %13, %14 : vector<16x1xf32>
    %16 = math.rsqrt %15 : vector<16x1xf32>
    %c0_6 = arith.constant 0 : index
    %c0_7 = arith.constant 0 : index
    %17 = vector.load %arg3[%c0_6, %c0_7] : memref<128x128xf32, #tpu.memory_space<vmem>>, vector<128x128xf32>
    %cst_8 = arith.constant dense<0.000000e+00> : vector<16x128xf32>
    %18 = tpu.matmul %0, %17, %cst_8 {dimension_numbers = #tpu.dot_dimension_numbers<[1], [0], [0], [1], [0, 0, 1, 1], [], []>} : vector<16x128xf32>, vector<128x128xf32>, vector<16x128xf32> -> vector<16x128xf32>
    %c0_9 = arith.constant 0 : index
    %c0_10 = arith.constant 0 : index
    %19 = vector.load %arg4[%c0_9, %c0_10] : memref<1x128xf32, #tpu.memory_space<vmem>>, vector<1x128xf32>
    %20 = vector.broadcast %7 : vector<16x1xf32> to vector<16x128xf32>
    %21 = vector.broadcast %19 : vector<1x128xf32> to vector<16x128xf32>
    %22 = arith.mulf %20, %21 : vector<16x128xf32>
    %23 = arith.subf %18, %22 : vector<16x128xf32>
    %24 = vector.broadcast %16 : vector<16x1xf32> to vector<16x128xf32>
    %25 = arith.mulf %23, %24 : vector<16x128xf32>
    %c0_11 = arith.constant 0 : index
    %c0_12 = arith.constant 0 : index
    %26 = vector.load %arg5[%c0_11, %c0_12] : memref<1x128xf32, #tpu.memory_space<vmem>>, vector<1x128xf32>
    %27 = vector.broadcast %26 : vector<1x128xf32> to vector<16x128xf32>
    %28 = arith.addf %25, %27 : vector<16x128xf32>
    %c0_13 = arith.constant 0 : index
    %c0_14 = arith.constant 0 : index
    %29 = vector.load %arg6[%c0_13, %c0_14] : memref<16x128xf32, #tpu.memory_space<vmem>>, vector<16x128xf32>
    tpu.vector_store %arg6[%c0_13, %c0_14], %28 {strides = array<i32>} : memref<16x128xf32, #tpu.memory_space<vmem>>, vector<16x128xf32>,
    return
  }
  func.func @transform_0(%arg0: i32, %arg1: i32) -> (i32, i32) {
    %c0_i32 = arith.constant 0 : i32
    %c0_i32_0 = arith.constant 0 : i32
    return %arg0, %c0_i32 : i32, i32
  }
  func.func @transform_1(%arg0: i32, %arg1: i32) -> (i32, i32) {
    %c0_i32 = arith.constant 0 : i32
    %c0_i32_0 = arith.constant 0 : i32
    return %c0_i32, %arg1 : i32, i32
  }
  func.func @transform_2(%arg0: i32, %arg1: i32) -> (i32, i32) {
    %c0_i32 = arith.constant 0 : i32
    %c0_i32_0 = arith.constant 0 : i32
    return %c0_i32, %arg1 : i32, i32
  }
  func.func @transform_3(%arg0: i32, %arg1: i32) -> (i32, i32) {
    %c0_i32 = arith.constant 0 : i32
    %c0_i32_0 = arith.constant 0 : i32
    return %c0_i32, %arg1 : i32, i32
  }
  func.func @transform_4(%arg0: i32, %arg1: i32) -> (i32, i32) {
    %c0_i32 = arith.constant 0 : i32
    return %arg0, %arg1 : i32, i32
  }
}

</mosaic_0001>

<bundles_post_ra>
// kernel: tpu_custom_call.1
= control target key start
LH: loop header
LB: loop body
LE: loop exit
PB: predicated region body
PF: predicated region fallthrough
CT: control target
= control target key end

     0   :  { %9 = vsyncpa [#allocation3], 0  ;;  %s454_s0 = inlined_call_operand.hbm [shape: f32[16,128], index: 0, kind: input, shape index: {}]   ;;  %s455_s1 = inlined_call_operand.hbm [shape: f32[128,128], index: 1, kind: input, shape index: {}]   ;;  %s456_s2 = inlined_call_operand.vmem [shape: f32[1,128], index: 2, kind: input, shape index: {}]   ;;  %s457_s3 = inlined_call_operand.vmem [shape: f32[1,128], index: 3, kind: input, shape index: {}]   ;;  %s458_s4 = inlined_call_operand.hbm [shape: f32[16,128], index: 4, kind: output, shape index: {}]  }
   0x1   :  { %10 = vsyncpa [#allocation6], 0 }
   0x2   :  { %11 = vsyncpa [#allocation4], 0  ;;  %s373_s15 = smov [#allocation2]   ;;  %s301_s19 = scalar_lea.hbm %s454_s0, 256 }
   0x3   :  { %s17_s16 = sshll.u32 %s373_s15, 4  ;;  %p302_p0 = scmp.ne.s32.totalorder %s454_s0, %s301_s19  ;;  %s18_s16 = int_to_ptr.vmem [resolvable:$true] %s17_s16 }
   0x4   :  { %p305_p1 = scmp.lt.u32.totalorder %s301_s19, %s454_s0 }
   0x6   :  { %p307_p2 = pnand %p305_p1, %p302_p0 }
   0x8   :  { %310 = shalt.err (!%p307_p2)
}
   0x9   :  { %s311_s24 = scalar_lea.vmem %s18_s16, 256  ;;  %p316_p4 = scmp.lt.s32.totalorder %s18_s16, %s18_s16 }
   0xa   :  { %p312_p3 = scmp.ne.s32.totalorder %s18_s16, %s311_s24  ;;  %p317_p5 = scmp.lt.s32.totalorder %s311_s24, %s311_s24 }
   0xc   :  { %p318_p6 = por %p317_p5, %p316_p4 }
   0xe   :  { %p319_p7 = pnand %p318_p6, %p312_p3 }
  0x10   :  { %322 = shalt.err (!%p319_p7)
}
  0x11   :  { %s374_s25 = smov 128   ;;  %s375_s26 = smov 8  }
  0x12   :  { %23 = dma.hbm_to_vmem [thread:$0]  %s454_s0, 256, %s18_s16, [#allocation3], %s374_s25, %s374_s25, %s375_s26  }
  0x13   :  { %s376_s29 = smov [#allocation5]   ;;  %s323_s7 = scalar_lea.hbm %s455_s1, 2048 }
  0x14   :  { %s29_s30 = sshll.u32 %s376_s29, 4  ;;  %p324_p8 = scmp.ne.s32.totalorder %s455_s1, %s323_s7  ;;  %s30_s30 = int_to_ptr.vmem [resolvable:$true] %s29_s30 }
  0x15   :  { %p327_p9 = scmp.lt.u32.totalorder %s323_s7, %s455_s1 }
  0x17   :  { %p329_p10 = pnand %p327_p9, %p324_p8 }
  0x19   :  { %332 = shalt.err (!%p329_p10)
}
  0x1a   :  { %s333_s12 = scalar_lea.vmem %s30_s30, 2048  ;;  %p338_p12 = scmp.lt.s32.totalorder %s30_s30, %s30_s30 }
  0x1b   :  { %p334_p11 = scmp.ne.s32.totalorder %s30_s30, %s333_s12  ;;  %p339_p13 = scmp.lt.s32.totalorder %s333_s12, %s333_s12 }
  0x1d   :  { %p340_p0 = por %p339_p13, %p338_p12 }
  0x1f   :  { %p341_p1 = pnand %p340_p0, %p334_p11 }
  0x21   :  { %344 = shalt.err (!%p341_p1)
}
  0x22   :  { %35 = dma.hbm_to_vmem [thread:$0]  %s455_s1, 2048, %s30_s30, [#allocation6], %s374_s25, %s374_s25, %s375_s26  }
  0x23   :  { %367 = dma.done.wait [#allocation3], 256  }
  0x24   :  { %368 = vsyncadd [#allocation3], 4294967040 }
  0x25   :  { %369 = dma.done.wait [#allocation6], 2048  }
  0x26   :  { %370 = vsyncadd [#allocation6], 4294965248  ;;  %v72_v0 = vld [vmem:[#allocation5] sm:$0xff]  ;;  %v73_v1 = vld [vmem:[#allocation5 + $0x8] sm:$0xff]  ;;  %s377_s17 = smov [#allocation7]  }
  0x27   :  { %v74_v2 = vld [vmem:[#allocation5 + $0x10] sm:$0xff]  ;;  %v260_v3 = vpack.c.bf16 %v73_v1, %v72_v0  ;;  %v75_v4 = vld [vmem:[#allocation5 + $0x18] sm:$0xff]  ;;  %v76_v6 = vld [vmem:[#allocation5 + $0x20] sm:$0xff]  ;;  %s192_s18 = sshll.u32 %s377_s17, 4  ;;  %s193_s18 = int_to_ptr.vmem [resolvable:$true] %s192_s18 }
  0x28   :  { %v264_v5 = vpack.c.bf16 %v75_v4, %v74_v2  ;;  %v77_v7 = vld [vmem:[#allocation5 + $0x28] sm:$0xff]  ;;  %v46_v9 = vld [vmem:[#allocation2] sm:$0xff]  ;;  %v79_v11 = vld [vmem:[#allocation5 + $0x38] sm:$0xff]  ;;  %p350_p3 = scmp.lt.s32.totalorder %s193_s18, %s193_s18 }
  0x29   :  { %261 = vmatprep.subr.bf16.mxu0 %v260_v3  ;;  %v268_v8 = vpack.c.bf16 %v77_v7, %v76_v6  ;;  %v78_v10 = vld [vmem:[#allocation5 + $0x30] sm:$0xff]  ;;  %257 = vmatprep.mubr.f32.mxu0 %v46_v9  ;;  %v52_v12 = vmul.f32 %v46_v9, %v46_v9  ;;  %v47_v13 = vld [vmem:[#allocation2 + $0x8] sm:$0xff]  ;;  %v80_v16 = vld [vmem:[#allocation5 + $0x40] sm:$0xff] }
  0x2a   :  { %263 = vmatpush3.bf16.msra.mxu0 %v260_v3  ;;  %48 = vadd.xlane.f32.xlu0 %v46_v9  ;;  %v53_v14 = vmul.f32 %v47_v13, %v47_v13  ;;  %v272_v15 = vpack.c.bf16 %v79_v11, %v78_v10  ;;  %v81_v17 = vld [vmem:[#allocation5 + $0x48] sm:$0xff]  ;;  %v82_v19 = vld [vmem:[#allocation5 + $0x50] sm:$0xff]  ;;  %v83_v20 = vld [vmem:[#allocation5 + $0x58] sm:$0xff] }
  0x2b   :  { %265 = vmatprep.subr.bf16.mxu0 %v264_v5  ;;  %54 = vadd.xlane.f32.xlu1 %v52_v12  ;;  %v276_v18 = vpack.c.bf16 %v81_v17, %v80_v16  ;;  %v280_v21 = vpack.c.bf16 %v83_v20, %v82_v19  ;;  %v84_v22 = vld [vmem:[#allocation5 + $0x60] sm:$0xff]  ;;  %v85_v23 = vld [vmem:[#allocation5 + $0x68] sm:$0xff]  ;;  %v86_v25 = vld [vmem:[#allocation5 + $0x70] sm:$0xff] }
  0x2c   :  { %v284_v24 = vpack.c.bf16 %v85_v23, %v84_v22  ;;  %v87_v26 = vld [vmem:[#allocation5 + $0x78] sm:$0xff]  ;;  %v205_v44 = vld [vmem:[%s456_s2] ss:$0 sm:$0xff]  ;;  %s345_s2 = scalar_lea.vmem %s193_s18, 256 }
  0x2d   :  { %v288_v27 = vpack.c.bf16 %v87_v26, %v86_v25  ;;  %v206_v51 = vld [vmem:[%s457_s3] ss:$0 sm:$0xff]  ;;  %p346_p2 = scmp.ne.s32.totalorder %s193_s18, %s345_s2  ;;  %p351_p4 = scmp.lt.s32.totalorder %s345_s2, %s345_s2 }
  0x2e   :  { %267 = vmatpush3.bf16.msra.mxu0 %v264_v5  ;;  %50 = vadd.xlane.f32.xlu0 %v47_v13 }
  0x2f   :  { %269 = vmatprep.subr.bf16.mxu0 %v268_v8  ;;  %56 = vadd.xlane.f32.xlu1 %v53_v14  ;;  %p352_p5 = por %p351_p4, %p350_p3 }
  0x31   :  { %p353_p6 = pnand %p352_p5, %p346_p2 }
  0x32   :  { %271 = vmatpush3.bf16.msra.mxu0 %v268_v8 }
  0x33   :  { %273 = vmatprep.subr.bf16.mxu0 %v272_v15 }
  0x36   :  { %275 = vmatpush3.bf16.msra.mxu0 %v272_v15 }
  0x37   :  { %277 = vmatprep.subr.bf16.mxu0 %v276_v18 }
  0x3a   :  { %279 = vmatpush3.bf16.msra.mxu0 %v276_v18 }
  0x3b   :  { %281 = vmatprep.subr.bf16.mxu0 %v280_v21 }
  0x3e   :  { %283 = vmatpush3.bf16.msra.mxu0 %v280_v21 }
  0x3f   :  { %285 = vmatprep.subr.bf16.mxu0 %v284_v24 }
  0x42   :  { %287 = vmatpush3.bf16.msra.mxu0 %v284_v24 }
  0x43   :  { %289 = vmatprep.subr.bf16.mxu0 %v288_v27 }
  0x46   :  { %291 = vmatpush3.bf16.msra.mxu0 %v288_v27 }
  0x49   :  { %258 = vmatmul.mubr.f32.vlgmr.msra.gmra.mrb[0].mxu0 %v47_v13 }
  0xb7   :  { %v49_v28 = vpop.xlane.xlu0 %48 }
  0xb8   :  { %v55_v29 = vpop.xlane.xlu1 %54  ;;  %v58_v33 = vmul.f32 0.03125, %v49_v28 }
  0xb9   :  { %v60_v37 = vmul.f32 0.03125, %v55_v29 }
  0xba   :  { %v62_v36 = vmul.f32 %v58_v33, %v58_v33  ;;  %v170_v48 = vmul.f32 %v205_v44, %v58_v33 }
  0xbb   :  { %v51_v30 = vpop.xlane.xlu0 %50 }
  0xbc   :  { %v59_v31 = vmul.f32 0.03125, %v51_v30  ;;  %v57_v32 = vpop.xlane.xlu1 %56  ;;  %v64_v39 = vsub.f32 %v60_v37, %v62_v36 }
  0xbd   :  { %v61_v35 = vmul.f32 0.03125, %v57_v32 }
  0xbe   :  { %v63_v34 = vmul.f32 %v59_v31, %v59_v31  ;;  %v66_v41 = vmax.f32 %v64_v39, 0.0  ;;  %v171_v45 = vmul.f32 %v205_v44, %v59_v31 }
  0xc0   :  { %v65_v38 = vsub.f32 %v61_v35, %v63_v34  ;;  %v68_v43 = vadd.f32 1e-05, %v66_v41 }
  0xc2   :  { %v67_v40 = vmax.f32 %v65_v38, 0.0 }
  0xc4   :  { %v69_v42 = vadd.f32 1e-05, %v67_v40 }
  0xc6   :  { %297 = vrsqrt.f32 %v69_v42 }
  0xc7   :  { %299 = vrsqrt.f32 %v68_v43 }
  0xd0   :  { %v298_v46 = vpop.eup %297 }
  0xd1   :  { %v300_v53 = vpop.eup %299 }
 0x11c   :  { %v259_v47 = vpop.f32.mrb[0].mxu0 }
 0x11d   :  { %v173_v49 = vsub.f32 %v259_v47, %v171_v45  ;;  %v154_v50 = vpop.f32.mrb[1].mxu0 }
 0x11e   :  { %v172_v52 = vsub.f32 %v154_v50, %v170_v48 }
 0x11f   :  { %v175_v54 = vmul.f32 %v298_v46, %v173_v49 }
 0x120   :  { %v174_v55 = vmul.f32 %v300_v53, %v172_v52 }
 0x121   :  { %v184_v56 = vadd.f32 %v206_v51, %v175_v54 }
 0x122   :  { %v183_v57 = vadd.f32 %v206_v51, %v174_v55 }
 0x123   :  { %186 = vst [vmem:[#allocation7 + $0x8] sm:$0xff] %v184_v56 }
 0x124   :  { %185 = vst [vmem:[#allocation7] sm:$0xff] %v183_v57 }
 0x125   :  { %356 = shalt.err (!%p353_p6)
}
 0x126   :  { %s357_s20 = scalar_lea.hbm %s458_s4, 256 }
 0x127   :  { %p358_p7 = scmp.ne.s32.totalorder %s458_s4, %s357_s20  ;;  %p361_p8 = scmp.lt.u32.totalorder %s357_s20, %s458_s4 }
 0x129   :  { %p363_p9 = pnand %p361_p8, %p358_p7 }
 0x12b   :  { %366 = shalt.err (!%p363_p9)
}
 0x12c   :  { %198 = dma.vmem_to_hbm [thread:$0]  %s193_s18, 256, %s458_s4, [#allocation4], %s374_s25, %s374_s25, %s375_s26  }
 0x12d   :  { %371 = dma.done.wait [#allocation4], 256  }
 0x12e   :  { %372 = vsyncadd [#allocation4], 4294967040 }
 0x12f   :  { %202 = vsyncpa [#allocation3], 1 }
 0x130   :  { %203 = vsyncpa [#allocation6], 1 }
 0x131   :  { %204 = vsyncpa [#allocation4], 1 }

</bundles_post_ra>
